<compile_context>
chip_gen: v7x
topology: tpu7x:2x2x1
jax: 0.10.0
libtpu: 0.0.40
codegen_flags: <defaults>
</compile_context>

<pallas_src>
import functools

import jax
import jax.numpy as jnp
from jax import lax
from jax.experimental import pallas as pl
from jax.experimental.pallas import tpu as pltpu


_ROWS_PER_CHUNK = 8          # sublane group; inner unroll factor
_MAX_TOKENS_PER_BLOCK = 512  # amortizes ~0.35us/step overhead at prefill sizes


def _round_up(x, m):
    return ((x + m - 1) // m) * m


def _vmem_capacity_bytes():
    """Physical VMEM of the attached TPU generation (conservative fallback)."""
    cap = 64 * 1024 * 1024            # v7x has 64 MiB; v5e/v6e have 128 MiB
    try:
        cap = int(pltpu.get_tpu_info().vmem_capacity_bytes)
    except Exception:                 # older jaxlib / no device info
        pass
    return cap


# ---------------------------------------------------------------------------
# Fast path: table resident in VMEM, gather via dynamic vector loads.
# ---------------------------------------------------------------------------
def _gather_kernel_resident(ids_ref, w_ref, out_ref, *, tokens_per_block):
    """ids_ref: (T_pad,) int32 SMEM (scalar-prefetched, already remapped)
    w_ref  : (V_pad, H) VMEM table, resident across all token tiles
    out_ref: (tokens_per_block, H) VMEM output tile."""
    base = pl.program_id(0) * tokens_per_block
    n_chunks = tokens_per_block // _ROWS_PER_CHUNK

    def chunk(c, carry):
        # Gather 8 rows with dynamic VMEM reads, then one aligned (8, H) store.
        start = pl.multiple_of(c * _ROWS_PER_CHUNK, _ROWS_PER_CHUNK)
        rows = [w_ref[pl.ds(ids_ref[base + start + j], 1), :]
                for j in range(_ROWS_PER_CHUNK)]
        out_ref[pl.ds(start, _ROWS_PER_CHUNK), :] = jnp.concatenate(rows, axis=0)
        return carry

    lax.fori_loop(0, n_chunks, chunk, 0)


def _gather_rows_resident(ids, table, *, tokens_per_block, vmem_limit_bytes):
    t_pad = ids.shape[0]
    v_rows, h_pad = table.shape
    grid = (t_pad // tokens_per_block,)
    kernel = functools.partial(_gather_kernel_resident,
                               tokens_per_block=tokens_per_block)
    return pl.pallas_call(
        kernel,
        out_shape=jax.ShapeDtypeStruct((t_pad, h_pad), table.dtype),
        grid_spec=pltpu.PrefetchScalarGridSpec(
            num_scalar_prefetch=1,                         # ids -> SMEM
            grid=grid,
            in_specs=[
                # Constant block index: the table is copied HBM->VMEM once and
                # stays resident across every token tile.
                pl.BlockSpec((v_rows, h_pad), lambda i, ids_sref: (0, 0)),
            ],
            out_specs=pl.BlockSpec((tokens_per_block, h_pad),
                                   lambda i, ids_sref: (i, 0)),
        ),
        compiler_params=pltpu.CompilerParams(
            dimension_semantics=("parallel",),             # tiles independent
            vmem_limit_bytes=vmem_limit_bytes),
    )(ids, table)


# ---------------------------------------------------------------------------
# Large-table path: per-row HBM->HBM DMAs, waits deferred one tile for overlap.
# ---------------------------------------------------------------------------
def _gather_kernel_hbm(ids_ref, w_hbm, out_hbm, sem, *, tokens_per_block):
    """ids_ref: (T_pad,) int32 SMEM; w_hbm/out_hbm: raw HBM refs (pl.ANY);
    sem: one shared DMA semaphore (all row copies are identically sized)."""
    i = pl.program_id(0)
    base = i * tokens_per_block
    n_chunks = tokens_per_block // _ROWS_PER_CHUNK

    def row_copy(dst_tok, src_row):
        return pltpu.make_async_copy(w_hbm.at[pl.ds(src_row, 1), :],
                                     out_hbm.at[pl.ds(dst_tok, 1), :],
                                     sem)

    def issue(c, carry):
        start = base + c * _ROWS_PER_CHUNK
        for j in range(_ROWS_PER_CHUNK):
            tok = start + j
            row_copy(tok, ids_ref[tok]).start()
        return carry

    # Issue this tile's row gathers first ...
    lax.fori_loop(0, n_chunks, issue, 0)

    def wait_one_tile():
        # Every copy is identically sized; waiting tokens_per_block row
        # descriptors against the shared semaphore drains exactly one tile's
        # worth of completions (order-agnostic).
        def w(c, carry):
            for _ in range(_ROWS_PER_CHUNK):
                row_copy(0, 0).wait()
            return carry
        lax.fori_loop(0, n_chunks, w, 0)

    # ... then wait for the PREVIOUS tile's copies (issued last grid step),
    # which have had this whole issue phase to complete -> cross-tile overlap.
    @pl.when(i > 0)
    def _():
        wait_one_tile()

    @pl.when(i == pl.num_programs(0) - 1)
    def _():
        wait_one_tile()                    # drain the final tile before exit


def _gather_rows_hbm(ids, table, *, tokens_per_block):
    t_pad = ids.shape[0]
    v_rows, h_pad = table.shape
    grid = (t_pad // tokens_per_block,)
    kernel = functools.partial(_gather_kernel_hbm,
                               tokens_per_block=tokens_per_block)
    return pl.pallas_call(
        kernel,
        out_shape=jax.ShapeDtypeStruct((t_pad, h_pad), table.dtype),
        grid_spec=pltpu.PrefetchScalarGridSpec(
            num_scalar_prefetch=1,
            grid=grid,
            in_specs=[pl.BlockSpec(memory_space=pl.ANY)],   # table stays in HBM
            out_specs=pl.BlockSpec(memory_space=pl.ANY),    # rows DMA'd in place
            scratch_shapes=[pltpu.SemaphoreType.DMA],       # one shared DMA sem
        ),
        compiler_params=pltpu.CompilerParams(
            # Deferred waits carry DMA state across grid steps -> sequential.
            dimension_semantics=("arbitrary",)),
    )(ids, table)


# ---------------------------------------------------------------------------
# Dispatcher
# ---------------------------------------------------------------------------
def _gather_rows(mapped_ids, table):
    """out[i] = table[mapped_ids[i]]; table's last row is the zero/null row."""
    num_tokens = int(mapped_ids.shape[0])
    v_rows, hidden = table.shape
    null_row = v_rows - 1

    # Lane-dense rows: pad hidden to a multiple of 128 (unmasked stores/DMAs).
    h_pad = _round_up(hidden, 128)
    if h_pad != hidden:
        table = jnp.pad(table, ((0, 0), (0, h_pad - hidden)))

    itemsize = jnp.dtype(table.dtype).itemsize
    row_bytes = h_pad * itemsize
    table_vmem_bytes = _round_up(v_rows, 8) * row_bytes   # sublane-padded layout

    cap = _vmem_capacity_bytes()
    budget = int(cap * 0.65)                 # headroom for Mosaic scratch etc.
    vmem_limit = max(32 * 1024 * 1024, int(cap * 0.8))

    # Adaptive token tile: decode batches don't pay for a full 128/512 tile of
    # dummy null-row work; prefill tiles grow to amortize per-step overhead.
    target_tpb = max(_ROWS_PER_CHUNK,
                     min(_MAX_TOKENS_PER_BLOCK,
                         _round_up(max(num_tokens, 1), _ROWS_PER_CHUNK)))

    # Resident path budget: 2x (double-buffered) table + 3x output tile.
    avail = budget - 2 * table_vmem_bytes
    resident = avail >= 3 * _ROWS_PER_CHUNK * row_bytes
    if resident:
        tpb_cap = (avail // (3 * row_bytes)) // _ROWS_PER_CHUNK * _ROWS_PER_CHUNK
        tpb = max(_ROWS_PER_CHUNK, min(target_tpb, tpb_cap))
    else:
        tpb = target_tpb

    t_pad = _round_up(max(num_tokens, 1), tpb)
    ids = jnp.full((t_pad,), null_row, dtype=jnp.int32)
    ids = ids.at[:num_tokens].set(mapped_ids.astype(jnp.int32))

    if resident:
        out = _gather_rows_resident(ids, table, tokens_per_block=tpb,
                                    vmem_limit_bytes=vmem_limit)
    else:
        out = _gather_rows_hbm(ids, table, tokens_per_block=tpb)
    return out[:num_tokens, :hidden]


def tensor_parallel_embedding_forward(input_ids, full_weight, *, world_size,
                                      reduce=True, rank=0):
    """Forward pass of TensorParallelEmbedding, emulating `world_size` ranks.

    input_ids:   (batch, seq) int32
    full_weight: (num_embeddings, hidden) float
    returns:     (batch, seq, hidden)
    """
    batch, seq = input_ids.shape
    num_embeddings, hidden = full_weight.shape
    block_size = num_embeddings // world_size   # floor division, as in the module
    ids_flat = input_ids.reshape(-1).astype(jnp.int32)
    zero_row = jnp.zeros((1, hidden), dtype=full_weight.dtype)

    if reduce or world_size == 1:
        # Fused all-rank path: the sum of per-rank partials equals one gather
        # over the first world_size*block_size rows; ids outside that range
        # (including the unsharded tail when num_embeddings % world_size != 0)
        # hit the appended zero row, exactly as they are nulled on every rank.
        eff = world_size * block_size
        table = jnp.concatenate([full_weight[:eff], zero_row], axis=0)
        mapped = jnp.where((ids_flat < 0) | (ids_flat >= eff), eff, ids_flat)
        # TODO(synk): on a real multi-device TP mesh the per-rank partials are
        # combined with an in-kernel ring all-reduce (make_async_remote_copy +
        # get_barrier_semaphore, collective_id set); single-device emulation
        # fuses the ranks into one gather instead.
    else:
        # reduce=False: return this rank's partial output only.
        min_id = rank * block_size
        max_id = min(num_embeddings, (rank + 1) * block_size)
        shard = full_weight[min_id:(rank + 1) * block_size]
        table = jnp.concatenate([shard, zero_row], axis=0)  # F.pad(..., (0,0,0,1))
        mapped = jnp.where((ids_flat < min_id) | (ids_flat >= max_id),
                           block_size, ids_flat - min_id)

    out = _gather_rows(mapped, table)
    return out.reshape(batch, seq, hidden)


if __name__ == "__main__":
    key = jax.random.PRNGKey(0)
    k_w, k_ids, k_w2, k_ids2 = jax.random.split(key, 4)

    # Pure-JAX reference of the module semantics (per-rank shard lookup + sum).
    def ref_tp(ids, weight, world_size, reduce=True, rank=0):
        num_emb, hidden = weight.shape
        bs = num_emb // world_size

        def one_rank(r):
            mn = r * bs
            mx = min(num_emb, (r + 1) * bs)
            shard = jnp.concatenate(
                [weight[mn:(r + 1) * bs], jnp.zeros((1, hidden), weight.dtype)], 0)
            m = jnp.where((ids < mn) | (ids >= mx), bs, ids - mn)
            return jnp.take(shard, m, axis=0)

        if reduce and world_size > 1:
            acc = jnp.zeros(ids.shape + (hidden,), weight.dtype)
            for r in range(world_size):
                acc = acc + one_rank(r)
            return acc
        return one_rank(rank)

    # Case 1: even shard, lane-aligned hidden, fused all-reduce path.
    num_embeddings, hidden, world_size = 64, 128, 2
    batch, seq = 2, 8
    w = jax.random.normal(k_w, (num_embeddings, hidden), dtype=jnp.float32)
    ids = jax.random.randint(k_ids, (batch, seq), 0, num_embeddings,
                             dtype=jnp.int32)

    out = tensor_parallel_embedding_forward(ids, w, world_size=world_size,
                                            reduce=True)
    out = jax.block_until_ready(out)
    assert out.shape == (batch, seq, hidden)
    assert jnp.allclose(out, ref_tp(ids, w, world_size), atol=1e-6)
    # Even shard -> also equals a plain (unsharded) embedding lookup.
    assert jnp.allclose(out, jnp.take(w, ids, axis=0), atol=1e-6)

    # Case 1b: reduce=False (single-rank partial output), rank 1.
    out_r1 = tensor_parallel_embedding_forward(ids, w, world_size=world_size,
                                               reduce=False, rank=1)
    out_r1 = jax.block_until_ready(out_r1)
    assert jnp.allclose(out_r1, ref_tp(ids, w, world_size, reduce=False, rank=1),
                        atol=1e-6)

    # Case 2: uneven shard (num_embeddings % world_size != 0) and hidden not a
    # multiple of 128 (exercises unsharded-tail nulling and lane padding).
    num_embeddings2, hidden2, world_size2 = 50, 72, 3
    batch2, seq2 = 2, 5
    w2 = jax.random.normal(k_w2, (num_embeddings2, hidden2), dtype=jnp.float32)
    ids2 = jax.random.randint(k_ids2, (batch2, seq2), 0, num_embeddings2,
                              dtype=jnp.int32)
    out2 = tensor_parallel_embedding_forward(ids2, w2, world_size=world_size2,
                                             reduce=True)
    out2 = jax.block_until_ready(out2)
    assert out2.shape == (batch2, seq2, hidden2)
    assert jnp.allclose(out2, ref_tp(ids2, w2, world_size2), atol=1e-6)

    print("KERNEL_OK")
</pallas_src>

<mosaic_0001>
module attributes {stable_mosaic.version = 11 : i64} {
  func.func @_gather_kernel_resident(%arg0: i32, %arg1: memref<16xi32, #tpu.memory_space<smem>>, %arg2: memref<65x128xf32, #tpu.memory_space<vmem>>, %arg3: memref<16x128xf32, #tpu.memory_space<vmem>>) attributes {dimension_semantics = [#tpu.dimension_semantics<parallel>], iteration_bounds = array<i64: 1>, scalar_prefetch = 1 : i64, scratch_operands = 0 : i64, tpu.core_type = #tpu.core_type<tc>, window_params = [{pipeline_mode = #tpu.pipeline_mode<synchronous>, transform_indices = @transform_0, window_bounds = array<i64: 65, 128>}, {transform_indices = @transform_1, window_bounds = array<i64: 16, 128>}]} {
    %c16_i32 = arith.constant 16 : i32
    %0 = arith.muli %arg0, %c16_i32 : i32
    %c0_i32 = arith.constant 0 : i32
    %c2_i32 = arith.constant 2 : i32
    %1 = arith.addi %c0_i32, %c2_i32 : i32
    %c1_i32 = arith.constant 1 : i32
    scf.for %arg4 = %c0_i32 to %1 step %c1_i32  : i32 {
      %c8_i32 = arith.constant 8 : i32
      %2 = arith.muli %arg4, %c8_i32 : i32
      %3 = tpu.assume_multiple %2, 8 : i32
      %4 = arith.addi %0, %3 : i32
      %c0_i32_1 = arith.constant 0 : i32
      %5 = arith.addi %4, %c0_i32_1 : i32
      %6 = arith.index_cast %5 : i32 to index
      %7 = memref.load %arg1[%6] : memref<16xi32, #tpu.memory_space<smem>>
      %8 = arith.index_cast %7 : i32 to index
      %c0 = arith.constant 0 : index
      %9 = vector.load %arg2[%8, %c0] : memref<65x128xf32, #tpu.memory_space<vmem>>, vector<1x128xf32>
      %10 = arith.addi %0, %3 : i32
      %c1_i32_2 = arith.constant 1 : i32
      %11 = arith.addi %10, %c1_i32_2 : i32
      %12 = arith.index_cast %11 : i32 to index
      %13 = memref.load %arg1[%12] : memref<16xi32, #tpu.memory_space<smem>>
      %14 = arith.index_cast %13 : i32 to index
      %c0_3 = arith.constant 0 : index
      %15 = vector.load %arg2[%14, %c0_3] : memref<65x128xf32, #tpu.memory_space<vmem>>, vector<1x128xf32>
      %16 = arith.addi %0, %3 : i32
      %c2_i32_4 = arith.constant 2 : i32
      %17 = arith.addi %16, %c2_i32_4 : i32
      %18 = arith.index_cast %17 : i32 to index
      %19 = memref.load %arg1[%18] : memref<16xi32, #tpu.memory_space<smem>>
      %20 = arith.index_cast %19 : i32 to index
      %c0_5 = arith.constant 0 : index
      %21 = vector.load %arg2[%20, %c0_5] : memref<65x128xf32, #tpu.memory_space<vmem>>, vector<1x128xf32>
      %22 = arith.addi %0, %3 : i32
      %c3_i32 = arith.constant 3 : i32
      %23 = arith.addi %22, %c3_i32 : i32
      %24 = arith.index_cast %23 : i32 to index
      %25 = memref.load %arg1[%24] : memref<16xi32, #tpu.memory_space<smem>>
      %26 = arith.index_cast %25 : i32 to index
      %c0_6 = arith.constant 0 : index
      %27 = vector.load %arg2[%26, %c0_6] : memref<65x128xf32, #tpu.memory_space<vmem>>, vector<1x128xf32>
      %28 = arith.addi %0, %3 : i32
      %c4_i32 = arith.constant 4 : i32
      %29 = arith.addi %28, %c4_i32 : i32
      %30 = arith.index_cast %29 : i32 to index
      %31 = memref.load %arg1[%30] : memref<16xi32, #tpu.memory_space<smem>>
      %32 = arith.index_cast %31 : i32 to index
      %c0_7 = arith.constant 0 : index
      %33 = vector.load %arg2[%32, %c0_7] : memref<65x128xf32, #tpu.memory_space<vmem>>, vector<1x128xf32>
      %34 = arith.addi %0, %3 : i32
      %c5_i32 = arith.constant 5 : i32
      %35 = arith.addi %34, %c5_i32 : i32
      %36 = arith.index_cast %35 : i32 to index
      %37 = memref.load %arg1[%36] : memref<16xi32, #tpu.memory_space<smem>>
      %38 = arith.index_cast %37 : i32 to index
      %c0_8 = arith.constant 0 : index
      %39 = vector.load %arg2[%38, %c0_8] : memref<65x128xf32, #tpu.memory_space<vmem>>, vector<1x128xf32>
      %40 = arith.addi %0, %3 : i32
      %c6_i32 = arith.constant 6 : i32
      %41 = arith.addi %40, %c6_i32 : i32
      %42 = arith.index_cast %41 : i32 to index
      %43 = memref.load %arg1[%42] : memref<16xi32, #tpu.memory_space<smem>>
      %44 = arith.index_cast %43 : i32 to index
      %c0_9 = arith.constant 0 : index
      %45 = vector.load %arg2[%44, %c0_9] : memref<65x128xf32, #tpu.memory_space<vmem>>, vector<1x128xf32>
      %46 = arith.addi %0, %3 : i32
      %c7_i32 = arith.constant 7 : i32
      %47 = arith.addi %46, %c7_i32 : i32
      %48 = arith.index_cast %47 : i32 to index
      %49 = memref.load %arg1[%48] : memref<16xi32, #tpu.memory_space<smem>>
      %50 = arith.index_cast %49 : i32 to index
      %c0_10 = arith.constant 0 : index
      %51 = vector.load %arg2[%50, %c0_10] : memref<65x128xf32, #tpu.memory_space<vmem>>, vector<1x128xf32>
      %52 = tpu.concatenate %9, %15, %21, %27, %33, %39, %45, %51 in 0 : vector<1x128xf32>, vector<1x128xf32>, vector<1x128xf32>, vector<1x128xf32>, vector<1x128xf32>, vector<1x128xf32>, vector<1x128xf32>, vector<1x128xf32> -> vector<8x128xf32>
      %53 = arith.index_cast %3 : i32 to index
      %c0_11 = arith.constant 0 : index
      %54 = vector.load %arg3[%53, %c0_11] : memref<16x128xf32, #tpu.memory_space<vmem>>, vector<8x128xf32>
      tpu.vector_store %arg3[%53, %c0_11], %52 {strides = array<i32>} : memref<16x128xf32, #tpu.memory_space<vmem>>, vector<8x128xf32>,
    }
    %c2_i32_0 = arith.constant 2 : i32
    return
  }
  func.func @transform_0(%arg0: i32, %arg1: memref<16xi32, #tpu.memory_space<smem>>) -> (i32, i32) {
    %c0_i32 = arith.constant 0 : i32
    %c0_i32_0 = arith.constant 0 : i32
    %c0_i32_1 = arith.constant 0 : i32
    return %c0_i32, %c0_i32_0 : i32, i32
  }
  func.func @transform_1(%arg0: i32, %arg1: memref<16xi32, #tpu.memory_space<smem>>) -> (i32, i32) {
    %c0_i32 = arith.constant 0 : i32
    %c0_i32_0 = arith.constant 0 : i32
    return %arg0, %c0_i32 : i32, i32
  }
}

</mosaic_0001>

<bundles_post_ra>
// kernel: tpu_custom_call.1
= control target key start
LH: loop header
LB: loop body
LE: loop exit
PB: predicated region body
PF: predicated region fallthrough
CT: control target
= control target key end

     0   :  { %s302_s0 = inlined_call_operand.hbm [shape: s32[16], index: 0, kind: input, shape index: {}]   ;;  %s303_s1 = inlined_call_operand.hbm [shape: f32[65,128], index: 1, kind: input, shape index: {}]   ;;  %s304_s2 = inlined_call_operand.hbm [shape: f32[16,128], index: 2, kind: output, shape index: {}]  }
   0x1   :  { %s151_s11 = scalar_lea.hbm %s302_s0, 16 }
   0x2   :  { %p152_p0 = scmp.ne.s32.totalorder %s302_s0, %s151_s11  ;;  %p155_p1 = scmp.lt.u32.totalorder %s151_s11, %s302_s0 }
   0x4   :  { %p157_p2 = pnand %p155_p1, %p152_p0 }
   0x6   :  { %160 = shalt.err (!%p157_p2)  }
   0x7   :  { %s219_s16 = smov [#allocation3]  }
   0x8   :  { %8 = dma.hbm_to_smem %s302_s0, 16, %s219_s16, [#allocation2] }
   0x9   :  { %209 = dma.done.wait [#allocation2], 16 }
   0xa   :  { %210 = vsyncadd [#allocation2], 4294967280 }
   0xb   :  { %10 = sfence }
   0xc   :  { %11 = vsyncpa [#allocation5], 0 }
   0xd   :  { %12 = vsyncpa [#allocation6], 0  ;;  %s220_s19 = smov [#allocation4]   ;;  %s161_s23 = scalar_lea.hbm %s303_s1, 1152 }
   0xe   :  { %s18_s20 = sshll.u32 %s220_s19, 4  ;;  %p162_p3 = scmp.ne.s32.totalorder %s303_s1, %s161_s23  ;;  %s19_s20 = int_to_ptr.vmem [resolvable:$true] %s18_s20 }
   0xf   :  { %p165_p4 = scmp.lt.u32.totalorder %s161_s23, %s303_s1 }
  0x11   :  { %p167_p5 = pnand %p165_p4, %p162_p3 }
  0x13   :  { %170 = shalt.err (!%p167_p5)
}
  0x14   :  { %s171_s0 = scalar_lea.vmem %s19_s20, 1152  ;;  %p176_p7 = scmp.lt.s32.totalorder %s19_s20, %s19_s20 }
  0x15   :  { %p172_p6 = scmp.ne.s32.totalorder %s19_s20, %s171_s0  ;;  %p177_p8 = scmp.lt.s32.totalorder %s171_s0, %s171_s0 }
  0x17   :  { %p178_p9 = por %p177_p8, %p176_p7 }
  0x19   :  { %p179_p10 = pnand %p178_p9, %p172_p6 }
  0x1b   :  { %182 = shalt.err (!%p179_p10)
}
  0x1c   :  { %s221_s28 = smov 128   ;;  %s222_s29 = smov 8  }
  0x1d   :  { %24 = dma.hbm_to_vmem [thread:$0]  %s303_s1, 1152, %s19_s20, [#allocation5], %s221_s28, %s221_s28, %s222_s29  }
  0x1e   :  { %211 = dma.done.wait [#allocation5], 1152  }
  0x1f   :  { %212 = vsyncadd [#allocation5], 4294966144  ;;  %s266_s4 = smov 0  }
  0x20 LB: > { %s272_s5 = sshll.u32 %s217_s4, 3  ;;  %vm89_vm0 = vcmask 1040384   ;;  %vm91_vm1 = vcmask 1041408   ;;  %vm93_vm2 = vcmask 1042432   ;;  %vm95_vm3 = vcmask 1043456   ;;  %s34_s4 = sadd.s32 1, %s217_s4   ;;  %s217_s4 = sphi %s266_s4, %s34_s4  }
  0x21   : > { %s37_s1 = sld [smem:[#allocation3 + %s272_s5]]  ;;  %s40_s6 = sadd.s32 1, %s272_s5  ;;  %vm97_vm4 = vcmask 1044480   ;;  %vm99_vm5 = vcmask 1045504   ;;  %vm101_vm6 = vcmask 1046528  }
  0x22   : > { %s41_s7 = sld [smem:[#allocation3 + %s40_s6]]  ;;  %s44_s8 = sadd.s32 2, %s272_s5 }
  0x23   : > { %s45_s9 = sld [smem:[#allocation3 + %s44_s8]]  ;;  %s48_s10 = sadd.s32 3, %s272_s5 }
  0x24   : > { %s49_s11 = sld [smem:[#allocation3 + %s48_s10]]  ;;  %s52_s12 = sadd.s32 4, %s272_s5 }
  0x25   : > { %s53_s13 = sld [smem:[#allocation3 + %s52_s12]]  ;;  %s56_s14 = sadd.s32 5, %s272_s5 }
  0x26   : > { %s57_s15 = sld [smem:[#allocation3 + %s56_s14]]  ;;  %s60_s16 = sadd.s32 6, %s272_s5 }
  0x27   : > { %s61_s17 = sld [smem:[#allocation3 + %s60_s16]]  ;;  %s64_s18 = sadd.s32 7, %s272_s5 }
  0x28   : > { %s38_s19 = scalar_lea.vmem [#allocation4], %s37_s1  ;;  %s42_s20 = scalar_lea.vmem [#allocation4], %s41_s7 }
  0x29   : > { %v39_v0 = vld [vmem:[%s38_s19] sm:$0x1]  ;;  %s65_s21 = sld [smem:[#allocation3 + %s64_s18]]  ;;  %s46_s22 = scalar_lea.vmem [#allocation4], %s45_s9 }
  0x2a   : > { %v43_v1 = vld [vmem:[%s42_s20] sm:$0x1]  ;;  %s50_s23 = scalar_lea.vmem [#allocation4], %s49_s11  ;;  %s103_s0 = scalar_lea.vmem [#allocation7], %s272_s5 }
  0x2b   : > { %v47_v2 = vld [vmem:[%s46_s22] sm:$0x1]  ;;  %v69_v3 = vrot.slane %v43_v1, 7  ;;  %s54_s24 = scalar_lea.vmem [#allocation4], %s53_s13  ;;  %p31_p11 = scmp.ge.s32.totalorder %s34_s4, 2  }
  0x2c   : > { %v51_v4 = vld [vmem:[%s50_s23] sm:$0x1]  ;;  %v72_v5 = vrot.slane %v47_v2, 6  ;;  %s58_s25 = scalar_lea.vmem [#allocation4], %s57_s15  ;;  %s223_s30 = smov (%p31_p11), [#allocation7]  }
  0x2d   : > { %v55_v6 = vld [vmem:[%s54_s24] sm:$0x1]  ;;  %v75_v7 = vrot.slane %v51_v4, 5  ;;  %v90_v8 = vsel %vm89_vm0, %v39_v0, %v69_v3  ;;  %s62_s26 = scalar_lea.vmem [#allocation4], %s61_s17  ;;  %s110_s3 = sshll.u32 (%p31_p11), %s223_s30, 4  ;;  %s111_s3 = int_to_ptr.vmem [resolvable:$true] %s110_s3 }
  0x2e   : > { %v59_v9 = vld [vmem:[%s58_s25] sm:$0x1]  ;;  %v78_v10 = vrot.slane %v55_v6, 4  ;;  %v92_v11 = vsel %vm91_vm1, %v90_v8, %v72_v5  ;;  %33 = sbr.rel (!%p31_p11) target bundleno = 32 (0x20), region = 44  ;;  %s183_s1 = scalar_lea.vmem (%p31_p11), %s111_s3, 256 }
  0x2f   : > { %v63_v12 = vld [vmem:[%s62_s26] sm:$0x1]  ;;  %v81_v13 = vrot.slane %v59_v9, 3  ;;  %v94_v14 = vsel %vm93_vm2, %v92_v11, %v75_v7  ;;  %s66_s27 = scalar_lea.vmem [#allocation4], %s65_s21  ;;  %p184_p12 = scmp.ne.s32.totalorder (%p31_p11), %s111_s3, %s183_s1 }
  0x30   : > { %v84_v15 = vrot.slane %v63_v12, 2  ;;  %v96_v16 = vsel %vm95_vm3, %v94_v14, %v78_v10  ;;  %v67_v17 = vld [vmem:[%s66_s27] sm:$0x1]  ;;  %p188_p13 = scmp.lt.s32.totalorder (%p31_p11), %s111_s3, %s111_s3  ;;  %p189_p0 = scmp.lt.s32.totalorder (%p31_p11), %s183_s1, %s183_s1 }
  0x31   : > { %v98_v18 = vsel %vm97_vm4, %v96_v16, %v81_v13  ;;  %v87_v19 = vrot.slane %v67_v17, 1 }
  0x32   : > { %v100_v20 = vsel %vm99_vm5, %v98_v18, %v84_v15  ;;  %p190_p1 = por (%p31_p11), %p189_p0, %p188_p13 }
  0x33   : > { %v102_v21 = vsel %vm101_vm6, %v100_v20, %v87_v19 }
  0x34   : > { %104 = vst [vmem:[%s103_s0] sm:$0xff] %v102_v21  ;;  %p191_p2 = pnand (%p31_p11), %p190_p1, %p184_p12 }
  0x36   :  { %194 = shalt.err (!%p191_p2)
}
  0x37   :  { %s195_s5 = scalar_lea.hbm %s304_s2, 256 }
  0x38   :  { %p196_p3 = scmp.ne.s32.totalorder %s304_s2, %s195_s5  ;;  %p199_p4 = scmp.lt.u32.totalorder %s195_s5, %s304_s2 }
  0x3a   :  { %p201_p5 = pnand %p199_p4, %p196_p3 }
  0x3c   :  { %204 = shalt.err (!%p201_p5)
}
  0x3d   :  { %116 = dma.vmem_to_hbm [thread:$0]  %s111_s3, 256, %s304_s2, [#allocation6], %s221_s28, %s221_s28, %s222_s29  }
  0x3e   :  { %213 = dma.done.wait [#allocation6], 256  }
  0x3f   :  { %214 = vsyncadd [#allocation6], 4294967040 }
  0x40   :  { %120 = vsyncpa [#allocation5], 1 }
  0x41   :  { %121 = vsyncpa [#allocation6], 1 }

</bundles_post_ra>
